<compile_context>
chip_gen: v5e
topology: v5e:2x2
jax: 0.10.0
libtpu: 0.0.40
codegen_flags: <defaults>
</compile_context>

<pallas_src>
import functools

import jax
import jax.numpy as jnp
from jax.experimental import pallas as pl
from jax.experimental.pallas import tpu as pltpu

H1_SIZE = 64
H2_SIZE = 64
LANE = 128
SUBLANE = 8


def _round_up(n, m):
    return ((n + m - 1) // m) * m


def _pad2(a, rows, cols, dtype):
    a = a.astype(dtype)
    return jnp.pad(a, ((0, rows - a.shape[0]), (0, cols - a.shape[1])))


def qnetwork_kernel(x_ref, w1_ref, b1_ref, w2_ref, b2_ref, w3_ref, b3_ref, o_ref):
    compute_dtype = w1_ref.dtype
    # fc1 + bias + ReLU  (accumulate in f32, epilogue fused on the accumulator)
    h1 = jnp.dot(x_ref[...], w1_ref[...], preferred_element_type=jnp.float32)
    h1 = jnp.maximum(h1 + b1_ref[...], 0.0).astype(compute_dtype)
    # fc2 + bias + ReLU
    h2 = jnp.dot(h1, w2_ref[...], preferred_element_type=jnp.float32)
    h2 = jnp.maximum(h2 + b2_ref[...], 0.0).astype(compute_dtype)
    # output layer (no activation); lane-dense (padded-to-128) store
    out = jnp.dot(h2, w3_ref[...], preferred_element_type=jnp.float32) + b3_ref[...]
    o_ref[...] = out.astype(o_ref.dtype)


@functools.partial(jax.jit, static_argnames=("block_b", "compute_dtype"))
def qnetwork_forward(x, params, *, block_b=512, compute_dtype=jnp.bfloat16):
    """x: [B, input_dim] float32.  params: dict of (w1,b1,w2,b2,w3,b3)."""
    w1, b1, w2, b2, w3, b3 = (
        params["w1"], params["b1"], params["w2"], params["b2"], params["w3"], params["b3"]
    )
    B, in_dim = x.shape
    out_dim = w3.shape[1]

    # Lane-dense feature widths (zero-padded columns/rows are inert under ReLU).
    h1p = _round_up(H1_SIZE, LANE)
    h2p = _round_up(H2_SIZE, LANE)
    outp = _round_up(out_dim, LANE)

    # Batch tile: multiple of 8 sublanes, clamped to the (padded) batch.
    tb = max(SUBLANE, _round_up(min(block_b, _round_up(B, SUBLANE)), SUBLANE))
    b_pad = _round_up(B, tb)
    num_blocks = b_pad // tb

    # Pad + cast operands once (weights bf16 for MXU, biases f32 for the f32 epilogue).
    xp = jnp.pad(x.astype(compute_dtype), ((0, b_pad - B), (0, 0)))
    w1p = _pad2(w1, in_dim, h1p, compute_dtype)
    w2p = _pad2(w2, h1p, h2p, compute_dtype)
    w3p = _pad2(w3, h2p, outp, compute_dtype)
    b1p = _pad2(b1, 1, h1p, jnp.float32)
    b2p = _pad2(b2, 1, h2p, jnp.float32)
    b3p = _pad2(b3, 1, outp, jnp.float32)

    itemsize = jnp.dtype(compute_dtype).itemsize
    flops = 2 * b_pad * (in_dim * h1p + h1p * h2p + h2p * outp)
    bytes_accessed = (
        xp.size * itemsize
        + (w1p.size + w2p.size + w3p.size) * itemsize
        + (b1p.size + b2p.size + b3p.size) * 4
        + b_pad * outp * 4
    )

    resident = lambda shape: pl.BlockSpec(shape, lambda i: (0, 0))

    out_padded = pl.pallas_call(
        qnetwork_kernel,
        out_shape=jax.ShapeDtypeStruct((b_pad, outp), jnp.float32),
        grid=(num_blocks,),
        in_specs=[
            pl.BlockSpec((tb, in_dim), lambda i: (i, 0)),   # x: streamed per batch tile
            resident(w1p.shape), resident(b1p.shape),       # params: VMEM-resident
            resident(w2p.shape), resident(b2p.shape),
            resident(w3p.shape), resident(b3p.shape),
        ],
        out_specs=pl.BlockSpec((tb, outp), lambda i: (i, 0)),
        compiler_params=pltpu.CompilerParams(
            dimension_semantics=("parallel",),
        ),
        cost_estimate=pl.CostEstimate(
            flops=flops, transcendentals=0, bytes_accessed=bytes_accessed
        ),
    )(xp, w1p, b1p, w2p, b2p, w3p, b3p)

    # Slice off batch/lane padding.
    return out_padded[:B, :out_dim]


def init_params(key, input_dim, output_dim):
    """Deterministic init mimicking nn.Linear default (U[-1/sqrt(fan_in), 1/sqrt(fan_in)])."""
    ks = jax.random.split(key, 6)

    def linear(kw, kb, fan_in, fan_out):
        bound = 1.0 / jnp.sqrt(jnp.float32(fan_in))
        w = jax.random.uniform(kw, (fan_in, fan_out), jnp.float32, -bound, bound)
        b = jax.random.uniform(kb, (1, fan_out), jnp.float32, -bound, bound)
        return w, b

    w1, b1 = linear(ks[0], ks[1], input_dim, H1_SIZE)
    w2, b2 = linear(ks[2], ks[3], H1_SIZE, H2_SIZE)
    w3, b3 = linear(ks[4], ks[5], H2_SIZE, output_dim)
    return {"w1": w1, "b1": b1, "w2": w2, "b2": b2, "w3": w3, "b3": b3}


def qnetwork_ref(x, p):
    h1 = jnp.maximum(x @ p["w1"] + p["b1"], 0.0)
    h2 = jnp.maximum(h1 @ p["w2"] + p["b2"], 0.0)
    return h2 @ p["w3"] + p["b3"]


if __name__ == "__main__":
    key = jax.random.PRNGKey(0)
    k_params, k_x, k_x2 = jax.random.split(key, 3)

    batch = 8
    input_dim = 8    # small state vector
    output_dim = 4   # number of discrete actions

    params = init_params(k_params, input_dim, output_dim)
    x = jax.random.normal(k_x, (batch, input_dim), jnp.float32)
    ref = qnetwork_ref(x, params)

    # 1) Exact-semantics check (f32 compute path).
    out_f32 = jax.block_until_ready(
        qnetwork_forward(x, params, compute_dtype=jnp.float32)
    )
    assert out_f32.shape == (batch, output_dim)
    assert jnp.allclose(out_f32, ref, atol=1e-4, rtol=1e-4)

    # 2) Default fast path (bf16 MXU operands, f32 accumulate).
    out_bf16 = jax.block_until_ready(qnetwork_forward(x, params))
    assert out_bf16.shape == (batch, output_dim)
    assert jnp.allclose(out_bf16, ref, atol=5e-2, rtol=5e-2)

    # 3) Exercise the multi-step batch-tiled grid (parallel batch axis).
    x_big = jax.random.normal(k_x2, (1024, input_dim), jnp.float32)
    out_big = jax.block_until_ready(
        qnetwork_forward(x_big, params, block_b=256, compute_dtype=jnp.float32)
    )
    assert out_big.shape == (1024, output_dim)
    assert jnp.allclose(out_big, qnetwork_ref(x_big, params), atol=1e-4, rtol=1e-4)

    print("KERNEL_OK")
</pallas_src>

<mosaic_0001>
module attributes {stable_mosaic.version = 11 : i64} {
  func.func @qnetwork_kernel(%arg0: i32, %arg1: memref<8x8xf32, #tpu.memory_space<vmem>>, %arg2: memref<8x128xf32, #tpu.memory_space<vmem>>, %arg3: memref<1x128xf32, #tpu.memory_space<vmem>>, %arg4: memref<128x128xf32, #tpu.memory_space<vmem>>, %arg5: memref<1x128xf32, #tpu.memory_space<vmem>>, %arg6: memref<128x128xf32, #tpu.memory_space<vmem>>, %arg7: memref<1x128xf32, #tpu.memory_space<vmem>>, %arg8: memref<8x128xf32, #tpu.memory_space<vmem>>) attributes {dimension_semantics = [#tpu.dimension_semantics<parallel>], iteration_bounds = array<i64: 1>, scalar_prefetch = 0 : i64, scratch_operands = 0 : i64, tpu.core_type = #tpu.core_type<tc>, window_params = [{transform_indices = @transform_0, window_bounds = array<i64: 8, 8>}, {pipeline_mode = #tpu.pipeline_mode<synchronous>, transform_indices = @transform_1, window_bounds = array<i64: 8, 128>}, {pipeline_mode = #tpu.pipeline_mode<synchronous>, transform_indices = @transform_2, window_bounds = array<i64: 1, 128>}, {pipeline_mode = #tpu.pipeline_mode<synchronous>, transform_indices = @transform_3, window_bounds = array<i64: 128, 128>}, {pipeline_mode = #tpu.pipeline_mode<synchronous>, transform_indices = @transform_4, window_bounds = array<i64: 1, 128>}, {pipeline_mode = #tpu.pipeline_mode<synchronous>, transform_indices = @transform_5, window_bounds = array<i64: 128, 128>}, {pipeline_mode = #tpu.pipeline_mode<synchronous>, transform_indices = @transform_6, window_bounds = array<i64: 1, 128>}, {transform_indices = @transform_7, window_bounds = array<i64: 8, 128>}]} {
    %c0 = arith.constant 0 : index
    %c0_0 = arith.constant 0 : index
    %0 = vector.load %arg1[%c0, %c0_0] : memref<8x8xf32, #tpu.memory_space<vmem>>, vector<8x8xf32>
    %c0_1 = arith.constant 0 : index
    %c0_2 = arith.constant 0 : index
    %1 = vector.load %arg2[%c0_1, %c0_2] : memref<8x128xf32, #tpu.memory_space<vmem>>, vector<8x128xf32>
    %cst = arith.constant dense<0.000000e+00> : vector<8x128xf32>
    %2 = tpu.matmul %0, %1, %cst {dimension_numbers = #tpu.dot_dimension_numbers<[1], [0], [0], [1], [0, 0, 1, 1], [], []>} : vector<8x8xf32>, vector<8x128xf32>, vector<8x128xf32> -> vector<8x128xf32>
    %c0_3 = arith.constant 0 : index
    %c0_4 = arith.constant 0 : index
    %3 = vector.load %arg3[%c0_3, %c0_4] : memref<1x128xf32, #tpu.memory_space<vmem>>, vector<1x128xf32>
    %4 = vector.broadcast %3 : vector<1x128xf32> to vector<8x128xf32>
    %5 = arith.addf %2, %4 : vector<8x128xf32>
    %cst_5 = arith.constant 0.000000e+00 : f32
    %6 = vector.broadcast %cst_5 : f32 to vector<8x128xf32>
    %7 = arith.maximumf %5, %6 : vector<8x128xf32>
    %c0_6 = arith.constant 0 : index
    %c0_7 = arith.constant 0 : index
    %8 = vector.load %arg4[%c0_6, %c0_7] : memref<128x128xf32, #tpu.memory_space<vmem>>, vector<128x128xf32>
    %cst_8 = arith.constant dense<0.000000e+00> : vector<8x128xf32>
    %9 = tpu.matmul %7, %8, %cst_8 {dimension_numbers = #tpu.dot_dimension_numbers<[1], [0], [0], [1], [0, 0, 1, 1], [], []>} : vector<8x128xf32>, vector<128x128xf32>, vector<8x128xf32> -> vector<8x128xf32>
    %c0_9 = arith.constant 0 : index
    %c0_10 = arith.constant 0 : index
    %10 = vector.load %arg5[%c0_9, %c0_10] : memref<1x128xf32, #tpu.memory_space<vmem>>, vector<1x128xf32>
    %11 = vector.broadcast %10 : vector<1x128xf32> to vector<8x128xf32>
    %12 = arith.addf %9, %11 : vector<8x128xf32>
    %cst_11 = arith.constant 0.000000e+00 : f32
    %13 = vector.broadcast %cst_11 : f32 to vector<8x128xf32>
    %14 = arith.maximumf %12, %13 : vector<8x128xf32>
    %c0_12 = arith.constant 0 : index
    %c0_13 = arith.constant 0 : index
    %15 = vector.load %arg6[%c0_12, %c0_13] : memref<128x128xf32, #tpu.memory_space<vmem>>, vector<128x128xf32>
    %cst_14 = arith.constant dense<0.000000e+00> : vector<8x128xf32>
    %16 = tpu.matmul %14, %15, %cst_14 {dimension_numbers = #tpu.dot_dimension_numbers<[1], [0], [0], [1], [0, 0, 1, 1], [], []>} : vector<8x128xf32>, vector<128x128xf32>, vector<8x128xf32> -> vector<8x128xf32>
    %c0_15 = arith.constant 0 : index
    %c0_16 = arith.constant 0 : index
    %17 = vector.load %arg7[%c0_15, %c0_16] : memref<1x128xf32, #tpu.memory_space<vmem>>, vector<1x128xf32>
    %18 = vector.broadcast %17 : vector<1x128xf32> to vector<8x128xf32>
    %19 = arith.addf %16, %18 : vector<8x128xf32>
    %c0_17 = arith.constant 0 : index
    %c0_18 = arith.constant 0 : index
    %20 = vector.load %arg8[%c0_17, %c0_18] : memref<8x128xf32, #tpu.memory_space<vmem>>, vector<8x128xf32>
    tpu.vector_store %arg8[%c0_17, %c0_18], %19 {strides = array<i32>} : memref<8x128xf32, #tpu.memory_space<vmem>>, vector<8x128xf32>,
    return
  }
  func.func @transform_0(%arg0: i32) -> (i32, i32) {
    %c0_i32 = arith.constant 0 : i32
    %c0_i32_0 = arith.constant 0 : i32
    return %arg0, %c0_i32 : i32, i32
  }
  func.func @transform_1(%arg0: i32) -> (i32, i32) {
    %c0_i32 = arith.constant 0 : i32
    %c0_i32_0 = arith.constant 0 : i32
    %c0_i32_1 = arith.constant 0 : i32
    return %c0_i32, %c0_i32_0 : i32, i32
  }
  func.func @transform_2(%arg0: i32) -> (i32, i32) {
    %c0_i32 = arith.constant 0 : i32
    %c0_i32_0 = arith.constant 0 : i32
    %c0_i32_1 = arith.constant 0 : i32
    return %c0_i32, %c0_i32_0 : i32, i32
  }
  func.func @transform_3(%arg0: i32) -> (i32, i32) {
    %c0_i32 = arith.constant 0 : i32
    %c0_i32_0 = arith.constant 0 : i32
    %c0_i32_1 = arith.constant 0 : i32
    return %c0_i32, %c0_i32_0 : i32, i32
  }
  func.func @transform_4(%arg0: i32) -> (i32, i32) {
    %c0_i32 = arith.constant 0 : i32
    %c0_i32_0 = arith.constant 0 : i32
    %c0_i32_1 = arith.constant 0 : i32
    return %c0_i32, %c0_i32_0 : i32, i32
  }
  func.func @transform_5(%arg0: i32) -> (i32, i32) {
    %c0_i32 = arith.constant 0 : i32
    %c0_i32_0 = arith.constant 0 : i32
    %c0_i32_1 = arith.constant 0 : i32
    return %c0_i32, %c0_i32_0 : i32, i32
  }
  func.func @transform_6(%arg0: i32) -> (i32, i32) {
    %c0_i32 = arith.constant 0 : i32
    %c0_i32_0 = arith.constant 0 : i32
    %c0_i32_1 = arith.constant 0 : i32
    return %c0_i32, %c0_i32_0 : i32, i32
  }
  func.func @transform_7(%arg0: i32) -> (i32, i32) {
    %c0_i32 = arith.constant 0 : i32
    %c0_i32_0 = arith.constant 0 : i32
    return %arg0, %c0_i32 : i32, i32
  }
}

</mosaic_0001>

<bundles_post_ra>
// kernel: qnetwork_forward.1
= control target key start
LH: loop header
LB: loop body
LE: loop exit
PB: predicated region body
PF: predicated region fallthrough
CT: control target
= control target key end

     0   :  { %vm32_vm0 = vcmask 64512   ;;  %s301_s1 = inlined_call_operand.vmem [shape: f32[8,128], index: 1, kind: input, shape index: {}]   ;;  %s302_s0 = inlined_call_operand.vmem [shape: f32[8,8], index: 0, kind: input, shape index: {}]   ;;  %s303_s3 = inlined_call_operand.vmem [shape: f32[128,128], index: 3, kind: input, shape index: {}]   ;;  %s304_s2 = inlined_call_operand.vmem [shape: f32[1,128], index: 2, kind: input, shape index: {}]   ;;  %s305_s4 = inlined_call_operand.vmem [shape: f32[1,128], index: 4, kind: input, shape index: {}]   ;;  %s306_s5 = inlined_call_operand.vmem [shape: f32[128,128], index: 5, kind: input, shape index: {}]   ;;  %s307_s6 = inlined_call_operand.vmem [shape: f32[1,128], index: 6, kind: input, shape index: {}]   ;;  %s308_s7 = inlined_call_operand.vmem [shape: f32[8,128], index: 7, kind: output, shape index: {}]  }
   0x1   :  { %v27_v0 = vld [vmem:[%s301_s1] sm:$0xff]  ;;  %v72_v2 = vld [vmem:[%s303_s3 + $0x78] sm:$0xff]  ;;  %v71_v3 = vld [vmem:[%s303_s3 + $0x70] sm:$0xff] }
   0x2   :  { %v26_v1 = vld [vmem:[%s302_s0] sm:$0xff]  ;;  %51 = vmatpush.msra.mxu0 %v27_v0  ;;  %77 = vmatpush.msra.mxu1 %v72_v2  ;;  %v70_v4 = vld [vmem:[%s303_s3 + $0x68] sm:$0xff]  ;;  %v68_v6 = vld [vmem:[%s303_s3 + $0x58] sm:$0xff] }
   0x3   :  { %143 = vmatmul.msk.f32.vlgmr.msra.gmra.mxu0 %vm32_vm0, %v26_v1  ;;  %v69_v5 = vld [vmem:[%s303_s3 + $0x60] sm:$0xff]  ;;  %v67_v7 = vld [vmem:[%s303_s3 + $0x50] sm:$0xff]  ;;  %v66_v8 = vld [vmem:[%s303_s3 + $0x48] sm:$0xff] }
   0x4   :  { %78 = vmatpush.msra.mxu1 %v71_v3  ;;  %v65_v9 = vld [vmem:[%s303_s3 + $0x40] sm:$0xff]  ;;  %v64_v10 = vld [vmem:[%s303_s3 + $0x38] sm:$0xff]  ;;  %v63_v11 = vld [vmem:[%s303_s3 + $0x30] sm:$0xff] }
   0x5   :  { %v62_v12 = vld [vmem:[%s303_s3 + $0x28] sm:$0xff]  ;;  %v61_v13 = vld [vmem:[%s303_s3 + $0x20] sm:$0xff]  ;;  %v60_v14 = vld [vmem:[%s303_s3 + $0x18] sm:$0xff] }
   0x6   :  { %79 = vmatpush.msra.mxu1 %v70_v4  ;;  %v59_v15 = vld [vmem:[%s303_s3 + $0x10] sm:$0xff]  ;;  %v58_v16 = vld [vmem:[%s303_s3 + $0x8] sm:$0xff]  ;;  %v57_v17 = vld [vmem:[%s303_s3] sm:$0xff] }
   0x7   :  { %v113_v18 = vld [vmem:[%s306_s5 + $0x78] sm:$0xff]  ;;  %v112_v19 = vld [vmem:[%s306_s5 + $0x70] sm:$0xff]  ;;  %v111_v20 = vld [vmem:[%s306_s5 + $0x68] sm:$0xff] }
   0x8   :  { %80 = vmatpush.msra.mxu1 %v69_v5  ;;  %118 = vmatpush.msra.mxu2 %v113_v18  ;;  %v110_v21 = vld [vmem:[%s306_s5 + $0x60] sm:$0xff]  ;;  %v109_v22 = vld [vmem:[%s306_s5 + $0x58] sm:$0xff]  ;;  %v108_v23 = vld [vmem:[%s306_s5 + $0x50] sm:$0xff] }
   0x9   :  { %v107_v24 = vld [vmem:[%s306_s5 + $0x48] sm:$0xff]  ;;  %v106_v25 = vld [vmem:[%s306_s5 + $0x40] sm:$0xff]  ;;  %v105_v26 = vld [vmem:[%s306_s5 + $0x38] sm:$0xff] }
   0xa   :  { %81 = vmatpush.msra.mxu1 %v68_v6  ;;  %119 = vmatpush.msra.mxu2 %v112_v19  ;;  %v104_v27 = vld [vmem:[%s306_s5 + $0x30] sm:$0xff]  ;;  %v103_v28 = vld [vmem:[%s306_s5 + $0x28] sm:$0xff]  ;;  %v102_v29 = vld [vmem:[%s306_s5 + $0x20] sm:$0xff] }
   0xb   :  { %v101_v30 = vld [vmem:[%s306_s5 + $0x18] sm:$0xff]  ;;  %v144_v31 = vld [vmem:[%s304_s2] ss:$0 sm:$0xff]  ;;  %v100_v35 = vld [vmem:[%s306_s5 + $0x10] sm:$0xff] }
   0xc   :  { %82 = vmatpush.msra.mxu1 %v67_v7  ;;  %120 = vmatpush.msra.mxu2 %v111_v20  ;;  %v99_v36 = vld [vmem:[%s306_s5 + $0x8] sm:$0xff]  ;;  %v98_v37 = vld [vmem:[%s306_s5] sm:$0xff] }
   0xd   :  { %v145_v38 = vld [vmem:[%s305_s4] ss:$0 sm:$0xff] }
   0xe   :  { %83 = vmatpush.msra.mxu1 %v66_v8  ;;  %121 = vmatpush.msra.mxu2 %v110_v21  ;;  %v146_v42 = vld [vmem:[%s307_s6] ss:$0 sm:$0xff] }
  0x10   :  { %84 = vmatpush.msra.mxu1 %v65_v9  ;;  %122 = vmatpush.msra.mxu2 %v109_v22 }
  0x12   :  { %85 = vmatpush.msra.mxu1 %v64_v10  ;;  %123 = vmatpush.msra.mxu2 %v108_v23 }
  0x14   :  { %86 = vmatpush.msra.mxu1 %v63_v11  ;;  %124 = vmatpush.msra.mxu2 %v107_v24 }
  0x16   :  { %87 = vmatpush.msra.mxu1 %v62_v12  ;;  %125 = vmatpush.msra.mxu2 %v106_v25 }
  0x18   :  { %88 = vmatpush.msra.mxu1 %v61_v13  ;;  %126 = vmatpush.msra.mxu2 %v105_v26 }
  0x1a   :  { %89 = vmatpush.msra.mxu1 %v60_v14  ;;  %127 = vmatpush.msra.mxu2 %v104_v27 }
  0x1c   :  { %90 = vmatpush.msra.mxu1 %v59_v15  ;;  %128 = vmatpush.msra.mxu2 %v103_v28 }
  0x1e   :  { %91 = vmatpush.msra.mxu1 %v58_v16  ;;  %129 = vmatpush.msra.mxu2 %v102_v29 }
  0x20   :  { %92 = vmatpush.msra.mxu1 %v57_v17  ;;  %130 = vmatpush.msra.mxu2 %v101_v30 }
  0x22   :  { %131 = vmatpush.msra.mxu2 %v100_v35 }
  0x24   :  { %132 = vmatpush.msra.mxu2 %v99_v36 }
  0x26   :  { %133 = vmatpush.msra.mxu2 %v98_v37 }
  0x80   :  { %v53_v32 = vpop.f32.mrf.mxu0 }
  0x81   :  { %v54_v33 = vadd.f32 %v144_v31, %v53_v32 }
  0x83   :  { %v56_v34 = vmax.f32 %v54_v33, 0.0 }
  0x85   :  { %93 = vmatmul.f32.vlgmr.msra.gmra.mxu1 %v56_v34 }
 0x102   :  { %v94_v39 = vpop.f32.mrf.mxu1 }
 0x103   :  { %v95_v40 = vadd.f32 %v145_v38, %v94_v39 }
 0x105   :  { %v97_v41 = vmax.f32 %v95_v40, 0.0 }
 0x107   :  { %134 = vmatmul.f32.vlgmr.msra.gmra.mxu2 %v97_v41 }
 0x18a   :  { %v135_v43 = vpop.f32.mrf.mxu2 }
 0x18b   :  { %v136_v44 = vadd.f32 %v146_v42, %v135_v43 }
 0x18d   :  { %138 = vst [vmem:[%s308_s7] sm:$0xff] %v136_v44 }

</bundles_post_ra>
